<compile_context>
chip_gen: v6e
topology: v6e:2x2x1
jax: 0.10.0
libtpu: 0.0.40
codegen_flags: <defaults>
</compile_context>

<pallas_src>
import math

import jax
import jax.numpy as jnp
from jax.experimental import pallas as pl
from jax.experimental.pallas import tpu as pltpu

LANE = 128


def _round_up(x, m):
    return (x + m - 1) // m * m


def _make_tptgcn_kernel(mxu_dtype, ne, p):
    """Fused 2-layer GCN + highway kernel.

    mxu_dtype: dtype fed to the MXU (bf16 recommended); accumulation is always
    f32 via preferred_element_type, and the elementwise tail is always f32.
    ne: number of entity rows (layer-1 rows); p: padded feature width (lane-dense).
    """
    f32 = jnp.float32

    def kernel(ex_ref, rx_ref, pa_ref, ra_ref,
               w1m_ref, b1_ref, w2m_ref, b2_ref, bg_ref, out_ref):
        ex = ex_ref[...]                       # (Ne, P) f32 carry path
        rx = rx_ref[...]                       # (Nr, P) f32 carry path
        bg = bg_ref[...]                       # (1, P) f32
        pa = pa_ref[...]                       # (Ne, Ne) already mxu dtype
        ra = ra_ref[...]                       # (N2, N2) already mxu dtype

        # r_x's layer-2 weight-side matmul has NO dependence on layer 1:
        # compute it straight from rx so the scheduler can overlap it with the
        # layer-1 chain.  st2_r = [rx@W2 | rx@Wm]  (Nr, 2P)
        st2_r = jnp.dot(rx.astype(mxu_dtype), w2m_ref[...],
                        preferred_element_type=f32)

        # ---- layer 1: one fused 256-wide matmul  [e_x@W1 | e_x@Wm] ----
        st1 = jnp.dot(ex.astype(mxu_dtype), w1m_ref[...],
                      preferred_element_type=f32)            # (Ne, 2P)
        g1 = jnp.dot(pa, st1[:, :p].astype(mxu_dtype),
                     preferred_element_type=f32)              # prim_adj @ support1
        g1 = jnp.maximum(g1 + b1_ref[...], 0.0)               # relu(. + b1)
        t1 = jax.nn.sigmoid(st1[:, p:] + bg)                  # highway gate on e_x
        h1 = t1 * g1 + (1.0 - t1) * ex                        # (Ne, P) f32

        # ---- layer 2: fused 256-wide matmul on the h1 rows ----
        st2_h = jnp.dot(h1.astype(mxu_dtype), w2m_ref[...],
                        preferred_element_type=f32)           # (Ne, 2P)
        # Only rela_adj @ support2 needs the stacked rows.
        s2 = jnp.concatenate([st2_h[:, :p], st2_r[:, :p]], axis=0)   # (N2, P)
        g2 = jnp.dot(ra, s2.astype(mxu_dtype), preferred_element_type=f32)
        g2 = jnp.maximum(g2 + b2_ref[...], 0.0)

        # Highway + output, written per row-half (no concat of the carry path).
        t2h = jax.nn.sigmoid(st2_h[:, p:] + bg)               # gate on h1 rows
        t2r = jax.nn.sigmoid(st2_r[:, p:] + bg)               # gate on r_x rows
        out_ref[:ne, :] = t2h * g2[:ne, :] + (1.0 - t2h) * h1
        out_ref[ne:, :] = t2r * g2[ne:, :] + (1.0 - t2r) * rx

    return kernel


def prepare_tptgcn(params, prim_adj, rela_adj, *, use_bf16_mxu=True):
    """One-time prep: pad + merge weights, pad biases, cast adjacency to MXU dtype.

    Hoisted out of the per-call path so repeated forward calls do no weight
    padding / casting work.
    """
    F, H = params["w1"].shape
    P = _round_up(max(F, H, LANE), LANE)
    mxu_dtype = jnp.bfloat16 if use_bf16_mxu else jnp.float32

    def pad_w(w):
        w = w.astype(jnp.float32)
        return jnp.pad(w, ((0, P - w.shape[0]), (0, P - w.shape[1])))

    def pad_b(b):
        b = b.astype(jnp.float32).reshape(1, -1)
        return jnp.pad(b, ((0, 0), (0, P - b.shape[1])))

    wm_p = pad_w(params["wm"])
    prepped = {
        # merged weight operands: one (P, 2P) matmul per layer on the weight side
        "w1m": jnp.concatenate([pad_w(params["w1"]), wm_p], axis=1).astype(mxu_dtype),
        "w2m": jnp.concatenate([pad_w(params["w2"]), wm_p], axis=1).astype(mxu_dtype),
        "b1": pad_b(params["b1"]),
        "b2": pad_b(params["b2"]),
        "bg": pad_b(params["bg"]),
        # adjacency carried in MXU dtype -> half the DMA bytes / VMEM when bf16
        "pa": prim_adj.astype(mxu_dtype),
        "ra": rela_adj.astype(mxu_dtype),
        "P": P,
        "H": H,
        "mxu_dtype": mxu_dtype,
    }
    return prepped


def tptgcn_forward(e_x, r_x, prepped):
    """Fused TPTGCN forward. Returns (Ne+Nr, nclass) f32."""
    Ne, _ = e_x.shape
    Nr, _ = r_x.shape
    N2 = Ne + Nr
    P = prepped["P"]
    H = prepped["H"]
    mxu_dtype = prepped["mxu_dtype"]
    assert prepped["pa"].shape == (Ne, Ne) and prepped["ra"].shape == (N2, N2)
    assert Ne % 8 == 0, "row-half output writes assume a sublane-aligned split"

    def pad_cols(a):
        a = a.astype(jnp.float32)
        return jnp.pad(a, ((0, 0), (0, P - a.shape[1])))

    out_p = pl.pallas_call(
        _make_tptgcn_kernel(mxu_dtype, Ne, P),
        out_shape=jax.ShapeDtypeStruct((N2, P), jnp.float32),
        grid_spec=pltpu.PrefetchScalarGridSpec(
            num_scalar_prefetch=0,
            grid=(1,),  # everything is VMEM-resident in one block at these sizes
            in_specs=[
                pl.BlockSpec((Ne, P), lambda i: (0, 0)),     # e_x (feature-padded)
                pl.BlockSpec((Nr, P), lambda i: (0, 0)),     # r_x (feature-padded)
                pl.BlockSpec((Ne, Ne), lambda i: (0, 0)),    # prim_adj (mxu dtype)
                pl.BlockSpec((N2, N2), lambda i: (0, 0)),    # rela_adj (mxu dtype)
                pl.BlockSpec((P, 2 * P), lambda i: (0, 0)),  # [W1 | Wm] merged
                pl.BlockSpec((1, P), lambda i: (0, 0)),      # b1
                pl.BlockSpec((P, 2 * P), lambda i: (0, 0)),  # [W2 | Wm] merged
                pl.BlockSpec((1, P), lambda i: (0, 0)),      # b2
                pl.BlockSpec((1, P), lambda i: (0, 0)),      # bg (highway gate bias)
            ],
            out_specs=pl.BlockSpec((N2, P), lambda i: (0, 0)),
        ),
        compiler_params=pltpu.CompilerParams(
            dimension_semantics=("arbitrary",)),
    )(
        pad_cols(e_x), pad_cols(r_x),
        prepped["pa"], prepped["ra"],
        prepped["w1m"], prepped["b1"],
        prepped["w2m"], prepped["b2"], prepped["bg"],
    )
    return out_p[:, :H]


def tptgcn_reference(e_x, r_x, prim_adj, rela_adj, p):
    """Pure-JAX replica of the PyTorch forward for verification."""
    def gc(x, adj, w, b):
        return adj @ (x @ w) + b

    def highway(l1, l2, wm, bg):
        tg = jax.nn.sigmoid(l1 @ wm + bg)
        return tg * l2 + (1.0 - tg) * l1

    gcn_x = jax.nn.relu(gc(e_x, prim_adj, p["w1"], p["b1"]))
    x = highway(e_x, gcn_x, p["wm"], p["bg"])
    x = jnp.concatenate([x, r_x], axis=0)
    gcn_x = jax.nn.relu(gc(x, rela_adj, p["w2"], p["b2"]))
    return highway(x, gcn_x, p["wm"], p["bg"])


def init_params(key, nfeat, nhid, nclass):
    ks = jax.random.split(key, 6)
    stdv1 = 1.0 / math.sqrt(nhid)
    stdv2 = 1.0 / math.sqrt(nclass)
    init_range = math.sqrt(6.0 / (nfeat + nfeat))
    return {
        "w1": jax.random.uniform(ks[0], (nfeat, nhid), jnp.float32, -stdv1, stdv1),
        "b1": jax.random.uniform(ks[1], (nhid,), jnp.float32, -stdv1, stdv1),
        "w2": jax.random.uniform(ks[2], (nhid, nclass), jnp.float32, -stdv2, stdv2),
        "b2": jax.random.uniform(ks[3], (nclass,), jnp.float32, -stdv2, stdv2),
        "wm": jax.random.uniform(ks[4], (nhid, nhid), jnp.float32,
                                 -init_range, init_range),
        "bg": jnp.zeros((nhid,), jnp.float32),
        # TODO(synk): self.linear2 is defined in __init__ but never used in
        # forward, so it is intentionally omitted.
        # TODO(synk): dropout with p>0 / training mode not implemented (p=0 here).
    }


if __name__ == "__main__":
    Ne, Nr = 16, 16                # entity / relation node counts
    nfeat = nhid = nclass = 32     # must all match for the highway to type-check

    key = jax.random.PRNGKey(0)
    k_ex, k_rx, k_pa, k_ra, k_par = jax.random.split(key, 5)

    e_x = jax.random.normal(k_ex, (Ne, nfeat), jnp.float32)
    r_x = jax.random.normal(k_rx, (Nr, nhid), jnp.float32)
    prim_adj = jax.random.uniform(k_pa, (Ne, Ne), jnp.float32)
    rela_adj = jax.random.uniform(k_ra, (Ne + Nr, Ne + Nr), jnp.float32)
    params = init_params(k_par, nfeat, nhid, nclass)

    ref = tptgcn_reference(e_x, r_x, prim_adj, rela_adj, params)

    # Exact check: same fused kernel with f32 MXU operands (adjacency kept f32).
    prep_f32 = prepare_tptgcn(params, prim_adj, rela_adj, use_bf16_mxu=False)
    out_f32 = jax.block_until_ready(tptgcn_forward(e_x, r_x, prep_f32))
    assert out_f32.shape == (Ne + Nr, nclass)
    assert jnp.allclose(out_f32, ref, atol=1e-4, rtol=1e-4), "f32 mismatch vs reference"

    # Performance path: bf16 MXU operands (incl. adjacency) with f32 accumulation
    # + f32 VPU/EUP tail.  Tolerance loosened for bf16 operand rounding.
    prep_bf16 = prepare_tptgcn(params, prim_adj, rela_adj, use_bf16_mxu=True)
    out = jax.block_until_ready(tptgcn_forward(e_x, r_x, prep_bf16))
    assert out.shape == (Ne + Nr, nclass)
    assert jnp.allclose(out, ref, atol=5e-2, rtol=5e-2), "bf16 mismatch vs reference"

    print("KERNEL_OK")
</pallas_src>

<mosaic_0001>
module attributes {stable_mosaic.version = 11 : i64} {
  func.func @kernel(%arg0: i32, %arg1: memref<16x128xf32, #tpu.memory_space<vmem>>, %arg2: memref<16x128xf32, #tpu.memory_space<vmem>>, %arg3: memref<16x16xf32, #tpu.memory_space<vmem>>, %arg4: memref<32x32xf32, #tpu.memory_space<vmem>>, %arg5: memref<128x256xf32, #tpu.memory_space<vmem>>, %arg6: memref<1x128xf32, #tpu.memory_space<vmem>>, %arg7: memref<128x256xf32, #tpu.memory_space<vmem>>, %arg8: memref<1x128xf32, #tpu.memory_space<vmem>>, %arg9: memref<1x128xf32, #tpu.memory_space<vmem>>, %arg10: memref<32x128xf32, #tpu.memory_space<vmem>>) attributes {dimension_semantics = [#tpu.dimension_semantics<arbitrary>], iteration_bounds = array<i64: 1>, scalar_prefetch = 0 : i64, scratch_operands = 0 : i64, tpu.core_type = #tpu.core_type<tc>, window_params = [{pipeline_mode = #tpu.pipeline_mode<synchronous>, transform_indices = @transform_0, window_bounds = array<i64: 16, 128>}, {pipeline_mode = #tpu.pipeline_mode<synchronous>, transform_indices = @transform_1, window_bounds = array<i64: 16, 128>}, {pipeline_mode = #tpu.pipeline_mode<synchronous>, transform_indices = @transform_2, window_bounds = array<i64: 16, 16>}, {pipeline_mode = #tpu.pipeline_mode<synchronous>, transform_indices = @transform_3, window_bounds = array<i64: 32, 32>}, {pipeline_mode = #tpu.pipeline_mode<synchronous>, transform_indices = @transform_4, window_bounds = array<i64: 128, 256>}, {pipeline_mode = #tpu.pipeline_mode<synchronous>, transform_indices = @transform_5, window_bounds = array<i64: 1, 128>}, {pipeline_mode = #tpu.pipeline_mode<synchronous>, transform_indices = @transform_6, window_bounds = array<i64: 128, 256>}, {pipeline_mode = #tpu.pipeline_mode<synchronous>, transform_indices = @transform_7, window_bounds = array<i64: 1, 128>}, {pipeline_mode = #tpu.pipeline_mode<synchronous>, transform_indices = @transform_8, window_bounds = array<i64: 1, 128>}, {pipeline_mode = #tpu.pipeline_mode<synchronous>, transform_indices = @transform_9, window_bounds = array<i64: 32, 128>}]} {
    %c0 = arith.constant 0 : index
    %c0_0 = arith.constant 0 : index
    %0 = vector.load %arg1[%c0, %c0_0] : memref<16x128xf32, #tpu.memory_space<vmem>>, vector<16x128xf32>
    %c0_1 = arith.constant 0 : index
    %c0_2 = arith.constant 0 : index
    %1 = vector.load %arg2[%c0_1, %c0_2] : memref<16x128xf32, #tpu.memory_space<vmem>>, vector<16x128xf32>
    %c0_3 = arith.constant 0 : index
    %c0_4 = arith.constant 0 : index
    %2 = vector.load %arg9[%c0_3, %c0_4] : memref<1x128xf32, #tpu.memory_space<vmem>>, vector<1x128xf32>
    %c0_5 = arith.constant 0 : index
    %c0_6 = arith.constant 0 : index
    %3 = vector.load %arg3[%c0_5, %c0_6] : memref<16x16xf32, #tpu.memory_space<vmem>>, vector<16x16xf32>
    %c0_7 = arith.constant 0 : index
    %c0_8 = arith.constant 0 : index
    %4 = vector.load %arg4[%c0_7, %c0_8] : memref<32x32xf32, #tpu.memory_space<vmem>>, vector<32x32xf32>
    %c0_9 = arith.constant 0 : index
    %c0_10 = arith.constant 0 : index
    %5 = vector.load %arg7[%c0_9, %c0_10] : memref<128x256xf32, #tpu.memory_space<vmem>>, vector<128x256xf32>
    %cst = arith.constant dense<0.000000e+00> : vector<16x256xf32>
    %6 = tpu.matmul %1, %5, %cst {dimension_numbers = #tpu.dot_dimension_numbers<[1], [0], [0], [1], [0, 0, 1, 1], [], []>} : vector<16x128xf32>, vector<128x256xf32>, vector<16x256xf32> -> vector<16x256xf32>
    %c0_11 = arith.constant 0 : index
    %c0_12 = arith.constant 0 : index
    %7 = vector.load %arg5[%c0_11, %c0_12] : memref<128x256xf32, #tpu.memory_space<vmem>>, vector<128x256xf32>
    %cst_13 = arith.constant dense<0.000000e+00> : vector<16x256xf32>
    %8 = tpu.matmul %0, %7, %cst_13 {dimension_numbers = #tpu.dot_dimension_numbers<[1], [0], [0], [1], [0, 0, 1, 1], [], []>} : vector<16x128xf32>, vector<128x256xf32>, vector<16x256xf32> -> vector<16x256xf32>
    %9 = vector.extract_strided_slice %8 {offsets = [0, 0], sizes = [16, 128], strides = [1, 1]} : vector<16x256xf32> to vector<16x128xf32>
    %cst_14 = arith.constant dense<0.000000e+00> : vector<16x128xf32>
    %10 = tpu.matmul %3, %9, %cst_14 {dimension_numbers = #tpu.dot_dimension_numbers<[1], [0], [0], [1], [0, 0, 1, 1], [], []>} : vector<16x16xf32>, vector<16x128xf32>, vector<16x128xf32> -> vector<16x128xf32>
    %c0_15 = arith.constant 0 : index
    %c0_16 = arith.constant 0 : index
    %11 = vector.load %arg6[%c0_15, %c0_16] : memref<1x128xf32, #tpu.memory_space<vmem>>, vector<1x128xf32>
    %12 = vector.broadcast %11 : vector<1x128xf32> to vector<16x128xf32>
    %13 = arith.addf %10, %12 : vector<16x128xf32>
    %cst_17 = arith.constant 0.000000e+00 : f32
    %14 = vector.broadcast %cst_17 : f32 to vector<16x128xf32>
    %15 = arith.maximumf %13, %14 : vector<16x128xf32>
    %16 = vector.extract_strided_slice %8 {offsets = [0, 128], sizes = [16, 128], strides = [1, 1]} : vector<16x256xf32> to vector<16x128xf32>
    %17 = vector.broadcast %2 : vector<1x128xf32> to vector<16x128xf32>
    %18 = arith.addf %16, %17 : vector<16x128xf32>
    %19 = arith.negf %18 : vector<16x128xf32>
    %20 = math.exp %19 : vector<16x128xf32>
    %cst_18 = arith.constant 1.000000e+00 : f32
    %21 = vector.broadcast %cst_18 : f32 to vector<16x128xf32>
    %22 = arith.addf %21, %20 : vector<16x128xf32>
    %23 = arith.divf %21, %22 : vector<16x128xf32>
    %24 = arith.mulf %23, %15 : vector<16x128xf32>
    %cst_19 = arith.constant 1.000000e+00 : f32
    %25 = vector.broadcast %cst_19 : f32 to vector<16x128xf32>
    %26 = arith.subf %25, %23 : vector<16x128xf32>
    %27 = arith.mulf %26, %0 : vector<16x128xf32>
    %28 = arith.addf %24, %27 : vector<16x128xf32>
    %c0_20 = arith.constant 0 : index
    %c0_21 = arith.constant 0 : index
    %29 = vector.load %arg7[%c0_20, %c0_21] : memref<128x256xf32, #tpu.memory_space<vmem>>, vector<128x256xf32>
    %cst_22 = arith.constant dense<0.000000e+00> : vector<16x256xf32>
    %30 = tpu.matmul %28, %29, %cst_22 {dimension_numbers = #tpu.dot_dimension_numbers<[1], [0], [0], [1], [0, 0, 1, 1], [], []>} : vector<16x128xf32>, vector<128x256xf32>, vector<16x256xf32> -> vector<16x256xf32>
    %31 = vector.extract_strided_slice %30 {offsets = [0, 0], sizes = [16, 128], strides = [1, 1]} : vector<16x256xf32> to vector<16x128xf32>
    %32 = vector.extract_strided_slice %6 {offsets = [0, 0], sizes = [16, 128], strides = [1, 1]} : vector<16x256xf32> to vector<16x128xf32>
    %33 = tpu.concatenate %31, %32 in 0 : vector<16x128xf32>, vector<16x128xf32> -> vector<32x128xf32>
    %cst_23 = arith.constant dense<0.000000e+00> : vector<32x128xf32>
    %34 = tpu.matmul %4, %33, %cst_23 {dimension_numbers = #tpu.dot_dimension_numbers<[1], [0], [0], [1], [0, 0, 1, 1], [], []>} : vector<32x32xf32>, vector<32x128xf32>, vector<32x128xf32> -> vector<32x128xf32>
    %c0_24 = arith.constant 0 : index
    %c0_25 = arith.constant 0 : index
    %35 = vector.load %arg8[%c0_24, %c0_25] : memref<1x128xf32, #tpu.memory_space<vmem>>, vector<1x128xf32>
    %36 = vector.broadcast %35 : vector<1x128xf32> to vector<32x128xf32>
    %37 = arith.addf %34, %36 : vector<32x128xf32>
    %cst_26 = arith.constant 0.000000e+00 : f32
    %38 = vector.broadcast %cst_26 : f32 to vector<32x128xf32>
    %39 = arith.maximumf %37, %38 : vector<32x128xf32>
    %40 = vector.extract_strided_slice %30 {offsets = [0, 128], sizes = [16, 128], strides = [1, 1]} : vector<16x256xf32> to vector<16x128xf32>
    %41 = vector.broadcast %2 : vector<1x128xf32> to vector<16x128xf32>
    %42 = arith.addf %40, %41 : vector<16x128xf32>
    %43 = arith.negf %42 : vector<16x128xf32>
    %44 = math.exp %43 : vector<16x128xf32>
    %cst_27 = arith.constant 1.000000e+00 : f32
    %45 = vector.broadcast %cst_27 : f32 to vector<16x128xf32>
    %46 = arith.addf %45, %44 : vector<16x128xf32>
    %47 = arith.divf %45, %46 : vector<16x128xf32>
    %48 = vector.extract_strided_slice %6 {offsets = [0, 128], sizes = [16, 128], strides = [1, 1]} : vector<16x256xf32> to vector<16x128xf32>
    %49 = vector.broadcast %2 : vector<1x128xf32> to vector<16x128xf32>
    %50 = arith.addf %48, %49 : vector<16x128xf32>
    %51 = arith.negf %50 : vector<16x128xf32>
    %52 = math.exp %51 : vector<16x128xf32>
    %cst_28 = arith.constant 1.000000e+00 : f32
    %53 = vector.broadcast %cst_28 : f32 to vector<16x128xf32>
    %54 = arith.addf %53, %52 : vector<16x128xf32>
    %55 = arith.divf %53, %54 : vector<16x128xf32>
    %56 = vector.extract_strided_slice %39 {offsets = [0, 0], sizes = [16, 128], strides = [1, 1]} : vector<32x128xf32> to vector<16x128xf32>
    %57 = arith.mulf %47, %56 : vector<16x128xf32>
    %cst_29 = arith.constant 1.000000e+00 : f32
    %58 = vector.broadcast %cst_29 : f32 to vector<16x128xf32>
    %59 = arith.subf %58, %47 : vector<16x128xf32>
    %60 = arith.mulf %59, %28 : vector<16x128xf32>
    %61 = arith.addf %57, %60 : vector<16x128xf32>
    %c0_30 = arith.constant 0 : index
    %c0_31 = arith.constant 0 : index
    %62 = vector.load %arg10[%c0_30, %c0_31] : memref<32x128xf32, #tpu.memory_space<vmem>>, vector<16x128xf32>
    tpu.vector_store %arg10[%c0_30, %c0_31], %61 {strides = array<i32>} : memref<32x128xf32, #tpu.memory_space<vmem>>, vector<16x128xf32>,
    %63 = vector.extract_strided_slice %39 {offsets = [16, 0], sizes = [16, 128], strides = [1, 1]} : vector<32x128xf32> to vector<16x128xf32>
    %64 = arith.mulf %55, %63 : vector<16x128xf32>
    %cst_32 = arith.constant 1.000000e+00 : f32
    %65 = vector.broadcast %cst_32 : f32 to vector<16x128xf32>
    %66 = arith.subf %65, %55 : vector<16x128xf32>
    %67 = arith.mulf %66, %1 : vector<16x128xf32>
    %68 = arith.addf %64, %67 : vector<16x128xf32>
    %c16 = arith.constant 16 : index
    %c0_33 = arith.constant 0 : index
    %69 = vector.load %arg10[%c16, %c0_33] : memref<32x128xf32, #tpu.memory_space<vmem>>, vector<16x128xf32>
    tpu.vector_store %arg10[%c16, %c0_33], %68 {strides = array<i32>} : memref<32x128xf32, #tpu.memory_space<vmem>>, vector<16x128xf32>,
    return
  }
  func.func @transform_0(%arg0: i32) -> (i32, i32) {
    %c0_i32 = arith.constant 0 : i32
    %c0_i32_0 = arith.constant 0 : i32
    %c0_i32_1 = arith.constant 0 : i32
    return %c0_i32, %c0_i32_0 : i32, i32
  }
  func.func @transform_1(%arg0: i32) -> (i32, i32) {
    %c0_i32 = arith.constant 0 : i32
    %c0_i32_0 = arith.constant 0 : i32
    %c0_i32_1 = arith.constant 0 : i32
    return %c0_i32, %c0_i32_0 : i32, i32
  }
  func.func @transform_2(%arg0: i32) -> (i32, i32) {
    %c0_i32 = arith.constant 0 : i32
    %c0_i32_0 = arith.constant 0 : i32
    %c0_i32_1 = arith.constant 0 : i32
    return %c0_i32, %c0_i32_0 : i32, i32
  }
  func.func @transform_3(%arg0: i32) -> (i32, i32) {
    %c0_i32 = arith.constant 0 : i32
    %c0_i32_0 = arith.constant 0 : i32
    %c0_i32_1 = arith.constant 0 : i32
    return %c0_i32, %c0_i32_0 : i32, i32
  }
  func.func @transform_4(%arg0: i32) -> (i32, i32) {
    %c0_i32 = arith.constant 0 : i32
    %c0_i32_0 = arith.constant 0 : i32
    %c0_i32_1 = arith.constant 0 : i32
    return %c0_i32, %c0_i32_0 : i32, i32
  }
  func.func @transform_5(%arg0: i32) -> (i32, i32) {
    %c0_i32 = arith.constant 0 : i32
    %c0_i32_0 = arith.constant 0 : i32
    %c0_i32_1 = arith.constant 0 : i32
    return %c0_i32, %c0_i32_0 : i32, i32
  }
  func.func @transform_6(%arg0: i32) -> (i32, i32) {
    %c0_i32 = arith.constant 0 : i32
    %c0_i32_0 = arith.constant 0 : i32
    %c0_i32_1 = arith.constant 0 : i32
    return %c0_i32, %c0_i32_0 : i32, i32
  }
  func.func @transform_7(%arg0: i32) -> (i32, i32) {
    %c0_i32 = arith.constant 0 : i32
    %c0_i32_0 = arith.constant 0 : i32
    %c0_i32_1 = arith.constant 0 : i32
    return %c0_i32, %c0_i32_0 : i32, i32
  }
  func.func @transform_8(%arg0: i32) -> (i32, i32) {
    %c0_i32 = arith.constant 0 : i32
    %c0_i32_0 = arith.constant 0 : i32
    %c0_i32_1 = arith.constant 0 : i32
    return %c0_i32, %c0_i32_0 : i32, i32
  }
  func.func @transform_9(%arg0: i32) -> (i32, i32) {
    %c0_i32 = arith.constant 0 : i32
    %c0_i32_0 = arith.constant 0 : i32
    %c0_i32_1 = arith.constant 0 : i32
    return %c0_i32, %c0_i32_0 : i32, i32
  }
}

</mosaic_0001>

<bundles_post_ra>
// kernel: tpu_custom_call.1
= control target key start
LH: loop header
LB: loop body
LE: loop exit
PB: predicated region body
PF: predicated region fallthrough
CT: control target
= control target key end

     0   :  { %14 = vsyncpa [#allocation3], 0  ;;  %s1160_s0 = inlined_call_operand.hbm [shape: f32[16,128], index: 0, kind: input, shape index: {}]   ;;  %s1161_s1 = inlined_call_operand.hbm [shape: f32[16,128], index: 1, kind: input, shape index: {}]   ;;  %s1162_s2 = inlined_call_operand.hbm [shape: f32[16,16], index: 2, kind: input, shape index: {}]   ;;  %s1163_s3 = inlined_call_operand.hbm [shape: f32[32,32], index: 3, kind: input, shape index: {}]   ;;  %s1164_s4 = inlined_call_operand.hbm [shape: f32[128,256], index: 4, kind: input, shape index: {}]   ;;  %s1165_s5 = inlined_call_operand.vmem [shape: f32[1,128], index: 5, kind: input, shape index: {}]   ;;  %s1166_s6 = inlined_call_operand.hbm [shape: f32[128,256], index: 6, kind: input, shape index: {}]   ;;  %s1167_s7 = inlined_call_operand.vmem [shape: f32[1,128], index: 7, kind: input, shape index: {}]   ;;  %s1168_s8 = inlined_call_operand.vmem [shape: f32[1,128], index: 8, kind: input, shape index: {}]   ;;  %s1169_s9 = inlined_call_operand.hbm [shape: f32[32,128], index: 9, kind: output, shape index: {}]  }
   0x1   :  { %15 = vsyncpa [#allocation6], 0 }
   0x2   :  { %16 = vsyncpa [#allocation9], 0 }
   0x3   :  { %17 = vsyncpa [#allocation12], 0 }
   0x4   :  { %18 = vsyncpa [#allocation4], 0  ;;  %s951_s30 = smov [#allocation5]   ;;  %s952_s11 = smov [#allocation8]  }
   0x5   :  { %s36_s10 = sshll.u32 %s951_s30, 4  ;;  %s60_s12 = sshll.u32 %s952_s11, 4  ;;  %s37_s10 = int_to_ptr.vmem [resolvable:$true] %s36_s10  ;;  %s61_s12 = int_to_ptr.vmem [resolvable:$true] %s60_s12 }
   0x6   :  { %s809_s13 = scalar_lea.vmem %s37_s10, 256  ;;  %p814_p1 = scmp.lt.s32.totalorder %s37_s10, %s37_s10 }
   0x7   :  { %p810_p0 = scmp.ne.s32.totalorder %s37_s10, %s809_s13  ;;  %p815_p2 = scmp.lt.s32.totalorder %s809_s13, %s809_s13 }
   0x9   :  { %p816_p3 = por %p815_p2, %p814_p1 }
   0xb   :  { %p817_p4 = pnand %p816_p3, %p810_p0 }
   0xd   :  { %820 = shalt.err (!%p817_p4)
}
   0xe   :  { %s953_s14 = smov 128   ;;  %s954_s15 = smov 8  }
   0xf   :  { %42 = dma.hbm_to_vmem [thread:$0]  %s1161_s1, 256, %s37_s10, [#allocation6], %s953_s14, %s953_s14, %s954_s15  }
  0x10   :  { %s829_s18 = scalar_lea.vmem %s61_s12, 512  ;;  %p834_p6 = scmp.lt.s32.totalorder %s61_s12, %s61_s12 }
  0x11   :  { %p830_p5 = scmp.ne.s32.totalorder %s61_s12, %s829_s18  ;;  %p835_p7 = scmp.lt.s32.totalorder %s829_s18, %s829_s18 }
  0x13   :  { %p836_p8 = por %p835_p7, %p834_p6 }
  0x15   :  { %p837_p9 = pnand %p836_p8, %p830_p5 }
  0x17   :  { %840 = shalt.err (!%p837_p9)
}
  0x18   :  { %66 = dma.hbm_to_vmem [thread:$0]  %s1163_s3, 512, %s61_s12, [#allocation9], %s953_s14, %s953_s14, %s954_s15  }
  0x19   :  { %s955_s21 = smov [#allocation2]   ;;  %s956_s23 = smov [#allocation7]  }
  0x1a   :  { %s24_s22 = sshll.u32 %s955_s21, 4  ;;  %s48_s24 = sshll.u32 %s956_s23, 4  ;;  %s25_s22 = int_to_ptr.vmem [resolvable:$true] %s24_s22  ;;  %s49_s24 = int_to_ptr.vmem [resolvable:$true] %s48_s24 }
  0x1b   :  { %s849_s1 = scalar_lea.vmem %s25_s22, 256  ;;  %p854_p11 = scmp.lt.s32.totalorder %s25_s22, %s25_s22 }
  0x1c   :  { %p850_p10 = scmp.ne.s32.totalorder %s25_s22, %s849_s1  ;;  %p855_p12 = scmp.lt.s32.totalorder %s849_s1, %s849_s1 }
  0x1e   :  { %p856_p13 = por %p855_p12, %p854_p11 }
  0x20   :  { %p857_p0 = pnand %p856_p13, %p850_p10 }
  0x22   :  { %860 = shalt.err (!%p857_p0)
}
  0x23   :  { %30 = dma.hbm_to_vmem [thread:$0]  %s1160_s0, 256, %s25_s22, [#allocation3], %s953_s14, %s953_s14, %s954_s15  }
  0x24   :  { %s869_s3 = scalar_lea.vmem %s49_s24, 256  ;;  %p874_p2 = scmp.lt.s32.totalorder %s49_s24, %s49_s24 }
  0x25   :  { %p870_p1 = scmp.ne.s32.totalorder %s49_s24, %s869_s3  ;;  %p875_p3 = scmp.lt.s32.totalorder %s869_s3, %s869_s3 }
  0x27   :  { %p876_p4 = por %p875_p3, %p874_p2 }
  0x29   :  { %p877_p5 = pnand %p876_p4, %p870_p1 }
  0x2b   :  { %880 = shalt.err (!%p877_p5)
}
  0x2c   :  { %54 = dma.hbm_to_vmem [thread:$0]  %s1162_s2, 256, %s49_s24, [#allocation6], %s953_s14, %s953_s14, %s954_s15  }
  0x2d   :  { %s957_s29 = smov [#allocation10]  }
  0x2e   :  { %s72_s30 = sshll.u32 %s957_s29, 4  ;;  %s73_s30 = int_to_ptr.vmem [resolvable:$true] %s72_s30 }
  0x2f   :  { %s889_s10 = scalar_lea.vmem %s73_s30, 4096  ;;  %p894_p7 = scmp.lt.s32.totalorder %s73_s30, %s73_s30 }
  0x30   :  { %p890_p6 = scmp.ne.s32.totalorder %s73_s30, %s889_s10  ;;  %p895_p8 = scmp.lt.s32.totalorder %s889_s10, %s889_s10 }
  0x32   :  { %p896_p9 = por %p895_p8, %p894_p7 }
  0x34   :  { %p897_p10 = pnand %p896_p9, %p890_p6 }
  0x36   :  { %900 = shalt.err (!%p897_p10)
}
  0x37   :  { %s958_s0 = smov 256   ;;  %s959_s11 = smov 16  }
  0x38   :  { %78 = dma.hbm_to_vmem [thread:$0]  %s1164_s4, 4096, %s73_s30, [#allocation9], %s958_s0, %s958_s0, %s959_s11  }
  0x39   :  { %s960_s16 = smov [#allocation11]  }
  0x3a   :  { %s86_s17 = sshll.u32 %s960_s16, 4  ;;  %s87_s17 = int_to_ptr.vmem [resolvable:$true] %s86_s17 }
  0x3b   :  { %s909_s2 = scalar_lea.vmem %s87_s17, 4096  ;;  %p914_p12 = scmp.lt.s32.totalorder %s87_s17, %s87_s17 }
  0x3c   :  { %p910_p11 = scmp.ne.s32.totalorder %s87_s17, %s909_s2  ;;  %p915_p13 = scmp.lt.s32.totalorder %s909_s2, %s909_s2 }
  0x3e   :  { %p916_p0 = por %p915_p13, %p914_p12 }
  0x40   :  { %p917_p1 = pnand %p916_p0, %p910_p11 }
  0x42   :  { %920 = shalt.err (!%p917_p1)
}
  0x43   :  { %92 = dma.hbm_to_vmem [thread:$0]  %s1166_s6, 4096, %s87_s17, [#allocation12], %s958_s0, %s958_s0, %s959_s11  }
  0x44   :  { %941 = dma.done.wait [#allocation3], 256  }
  0x45   :  { %942 = vsyncadd [#allocation3], 4294967040 }
  0x46   :  { %943 = dma.done.wait [#allocation6], 512  }
  0x47   :  { %944 = vsyncadd [#allocation6], 4294966784 }
  0x48   :  { %945 = dma.done.wait [#allocation9], 4608  }
  0x49   :  { %946 = vsyncadd [#allocation9], 4294962688 }
  0x4a   :  { %947 = dma.done.wait [#allocation12], 4096  }
  0x4b   :  { %948 = vsyncadd [#allocation12], 4294963200  ;;  %v961_v0 = vmov 0.0   ;;  %v266_v1 = vld [vmem:[#allocation10 + $0xf8] sm:$0xff]  ;;  %v265_v2 = vld [vmem:[#allocation10 + $0xf0] sm:$0xff]  ;;  %vm351_vm0 = vcmask 130048  }
  0x4c   :  { %331 = vmatprep.mubr.f32.mxu1 %v961_v0  ;;  %222 = vmatprep.mubr.f32.mxu0 %v961_v0  ;;  %v264_v3 = vld [vmem:[#allocation10 + $0xe8] sm:$0xff]  ;;  %v263_v4 = vld [vmem:[#allocation10 + $0xe0] sm:$0xff]  ;;  %v262_v5 = vld [vmem:[#allocation10 + $0xd8] sm:$0xff]  ;;  %vm547_vm1 = vcmask 261120  }
  0x4d   :  { %267 = vmatprep.subr.mxu1 %v266_v1  ;;  %v261_v6 = vld [vmem:[#allocation10 + $0xd0] sm:$0xff]  ;;  %v260_v7 = vld [vmem:[#allocation10 + $0xc8] sm:$0xff]  ;;  %v259_v8 = vld [vmem:[#allocation10 + $0xc0] sm:$0xff] }
  0x4e   :  { %268 = vmatpush1.msra.mxu1 %v265_v2  ;;  %v258_v9 = vld [vmem:[#allocation10 + $0xb8] sm:$0xff]  ;;  %v257_v10 = vld [vmem:[#allocation10 + $0xb0] sm:$0xff]  ;;  %v256_v11 = vld [vmem:[#allocation10 + $0xa8] sm:$0xff] }
  0x4f   :  { %269 = vmatprep.subr.mxu1 %v264_v3  ;;  %v255_v12 = vld [vmem:[#allocation10 + $0xa0] sm:$0xff]  ;;  %v254_v13 = vld [vmem:[#allocation10 + $0x98] sm:$0xff]  ;;  %v253_v14 = vld [vmem:[#allocation10 + $0x90] sm:$0xff] }
  0x50   :  { %270 = vmatpush1.msra.mxu1 %v263_v4  ;;  %v1045_v15 = vld [vmem:[#allocation11 + $0xf8] sm:$0xff]  ;;  %v1047_v16 = vld [vmem:[#allocation11 + $0xf0] sm:$0xff]  ;;  %v252_v17 = vld [vmem:[#allocation10 + $0x88] sm:$0xff] }
  0x51   :  { %271 = vmatprep.subr.mxu1 %v262_v5  ;;  %158 = vmatprep.subr.mxu0 %v1045_v15  ;;  %v1050_v18 = vld [vmem:[#allocation11 + $0xe8] sm:$0xff]  ;;  %v1052_v19 = vld [vmem:[#allocation11 + $0xe0] sm:$0xff]  ;;  %v1055_v21 = vld [vmem:[#allocation11 + $0xd8] sm:$0xff] }
  0x52   :  { %272 = vmatpush1.msra.mxu1 %v261_v6  ;;  %v251_v20 = vld [vmem:[#allocation10 + $0x80] sm:$0xff]  ;;  %159 = vmatpush1.msra.mxu0 %v1047_v16  ;;  %v250_v22 = vld [vmem:[#allocation10 + $0x78] sm:$0xff]  ;;  %v1058_v23 = vld [vmem:[#allocation11 + $0xd0] sm:$0xff] }
  0x53   :  { %273 = vmatprep.subr.mxu1 %v260_v7  ;;  %160 = vmatprep.subr.mxu0 %v1050_v18  ;;  %v249_v24 = vld [vmem:[#allocation10 + $0x70] sm:$0xff]  ;;  %v1061_v25 = vld [vmem:[#allocation11 + $0xc8] sm:$0xff]  ;;  %v1064_v27 = vld [vmem:[#allocation11 + $0xc0] sm:$0xff] }
  0x54   :  { %274 = vmatpush1.msra.mxu1 %v259_v8  ;;  %161 = vmatpush1.msra.mxu0 %v1052_v19  ;;  %v248_v26 = vld [vmem:[#allocation10 + $0x68] sm:$0xff]  ;;  %v247_v28 = vld [vmem:[#allocation10 + $0x60] sm:$0xff]  ;;  %v1067_v29 = vld [vmem:[#allocation11 + $0xb8] sm:$0xff] }
  0x55   :  { %275 = vmatprep.subr.mxu1 %v258_v9  ;;  %162 = vmatprep.subr.mxu0 %v1055_v21  ;;  %v246_v30 = vld [vmem:[#allocation10 + $0x58] sm:$0xff]  ;;  %v1070_v31 = vld [vmem:[#allocation11 + $0xb0] sm:$0xff]  ;;  %v1073_v33 = vld [vmem:[#allocation11 + $0xa8] sm:$0xff] }
  0x56   :  { %276 = vmatpush1.msra.mxu1 %v257_v10  ;;  %163 = vmatpush1.msra.mxu0 %v1058_v23  ;;  %v245_v32 = vld [vmem:[#allocation10 + $0x50] sm:$0xff]  ;;  %v244_v34 = vld [vmem:[#allocation10 + $0x48] sm:$0xff]  ;;  %v1076_v35 = vld [vmem:[#allocation11 + $0xa0] sm:$0xff] }
  0x57   :  { %277 = vmatprep.subr.mxu1 %v256_v11  ;;  %164 = vmatprep.subr.mxu0 %v1061_v25  ;;  %v243_v36 = vld [vmem:[#allocation10 + $0x40] sm:$0xff]  ;;  %v1079_v37 = vld [vmem:[#allocation11 + $0x98] sm:$0xff]  ;;  %v1082_v39 = vld [vmem:[#allocation11 + $0x90] sm:$0xff] }
  0x58   :  { %278 = vmatpush1.msra.mxu1 %v255_v12  ;;  %165 = vmatpush1.msra.mxu0 %v1064_v27  ;;  %v242_v38 = vld [vmem:[#allocation10 + $0x38] sm:$0xff]  ;;  %v241_v40 = vld [vmem:[#allocation10 + $0x30] sm:$0xff]  ;;  %v1085_v41 = vld [vmem:[#allocation11 + $0x88] sm:$0xff] }
  0x59   :  { %279 = vmatprep.subr.mxu1 %v254_v13  ;;  %166 = vmatprep.subr.mxu0 %v1067_v29  ;;  %v240_v42 = vld [vmem:[#allocation10 + $0x28] sm:$0xff]  ;;  %v1088_v43 = vld [vmem:[#allocation11 + $0x80] sm:$0xff]  ;;  %v1091_v45 = vld [vmem:[#allocation11 + $0x78] sm:$0xff] }
  0x5a   :  { %280 = vmatpush1.msra.mxu1 %v253_v14  ;;  %167 = vmatpush1.msra.mxu0 %v1070_v31  ;;  %v239_v44 = vld [vmem:[#allocation10 + $0x20] sm:$0xff]  ;;  %v238_v46 = vld [vmem:[#allocation10 + $0x18] sm:$0xff]  ;;  %v1094_v47 = vld [vmem:[#allocation11 + $0x70] sm:$0xff] }
  0x5b   :  { %281 = vmatprep.subr.mxu1 %v252_v17  ;;  %168 = vmatprep.subr.mxu0 %v1073_v33  ;;  %v237_v48 = vld [vmem:[#allocation10 + $0x10] sm:$0xff]  ;;  %v1097_v49 = vld [vmem:[#allocation11 + $0x68] sm:$0xff]  ;;  %v138_v51 = vld [vmem:[#allocation11 + $0x60] sm:$0xff] }
  0x5c   :  { %282 = vmatpush1.msra.mxu1 %v251_v20  ;;  %169 = vmatpush1.msra.mxu0 %v1076_v35  ;;  %v236_v50 = vld [vmem:[#allocation10 + $0x8] sm:$0xff]  ;;  %v235_v52 = vld [vmem:[#allocation10] sm:$0xff]  ;;  %v137_v53 = vld [vmem:[#allocation11 + $0x58] sm:$0xff] }
  0x5d   :  { %283 = vmatprep.subr.mxu1 %v250_v22  ;;  %170 = vmatprep.subr.mxu0 %v1079_v37  ;;  %v1101_v54 = vld [vmem:[#allocation2] sm:$0xff]  ;;  %v135_v56 = vld [vmem:[#allocation11 + $0x48] sm:$0xff]  ;;  %v134_v57 = vld [vmem:[#allocation11 + $0x40] sm:$0xff] }
  0x5e   :  { %284 = vmatpush1.msra.mxu1 %v249_v24  ;;  %171 = vmatpush1.msra.mxu0 %v1082_v39  ;;  %v136_v55 = vld [vmem:[#allocation11 + $0x50] sm:$0xff]  ;;  %v133_v58 = vld [vmem:[#allocation11 + $0x38] sm:$0xff]  ;;  %v131_v61 = vld [vmem:[#allocation11 + $0x28] sm:$0xff] }
  0x5f   :  { %285 = vmatprep.subr.mxu1 %v248_v26  ;;  %172 = vmatprep.subr.mxu0 %v1085_v41  ;;  %v1106_v59 = vld [vmem:[#allocation2 + $0x8] sm:$0xff]  ;;  %v132_v60 = vld [vmem:[#allocation11 + $0x30] sm:$0xff]  ;;  %v130_v62 = vld [vmem:[#allocation11 + $0x20] sm:$0xff] }
  0x60   :  { %286 = vmatpush1.msra.mxu1 %v247_v28  ;;  %173 = vmatpush1.msra.mxu0 %v1088_v43  ;;  %v129_v63 = vld [vmem:[#allocation11 + $0x18] sm:$0xff]  ;;  %v128_v1 = vld [vmem:[#allocation11 + $0x10] sm:$0xff]  ;;  %v127_v2 = vld [vmem:[#allocation11 + $0x8] sm:$0xff] }
  0x61   :  { %287 = vmatprep.subr.mxu1 %v246_v30  ;;  %174 = vmatprep.subr.mxu0 %v1091_v45  ;;  %v126_v3 = vld [vmem:[#allocation11] sm:$0xff]  ;;  %v1133_v5 = vld [vmem:[#allocation5 + $0x8] sm:$0xff]  ;;  %v120_v6 = vld [vmem:[#allocation7] sm:$0xff] }
  0x62   :  { %288 = vmatpush1.msra.mxu1 %v245_v32  ;;  %175 = vmatpush1.msra.mxu0 %v1094_v47  ;;  %v1114_v4 = vld [vmem:[#allocation5] sm:$0xff]  ;;  %v121_v10 = vld [vmem:[#allocation7 + $0x8] sm:$0xff]  ;;  %v720_v14 = vld [vmem:[%s1168_s8] ss:$0 sm:$0xff] }
  0x63   :  { %289 = vmatprep.subr.mxu1 %v244_v34  ;;  %176 = vmatprep.subr.mxu0 %v1097_v49 }
  0x64   :  { %290 = vmatpush1.msra.mxu1 %v243_v36  ;;  %177 = vmatpush1.msra.mxu0 %v138_v51 }
  0x65   :  { %291 = vmatprep.subr.mxu1 %v242_v38  ;;  %178 = vmatprep.subr.mxu0 %v137_v53 }
  0x66   :  { %292 = vmatpush1.msra.mxu1 %v241_v40  ;;  %179 = vmatpush1.msra.mxu0 %v136_v55 }
  0x67   :  { %293 = vmatprep.subr.mxu1 %v240_v42  ;;  %180 = vmatprep.subr.mxu0 %v135_v56  ;;  %v122_v42 = vld [vmem:[#allocation8] sm:$0xff] }
  0x68   :  { %294 = vmatpush1.msra.mxu1 %v239_v44  ;;  %181 = vmatpush1.msra.mxu0 %v134_v57 }
  0x69   :  { %295 = vmatprep.subr.mxu1 %v238_v46  ;;  %182 = vmatprep.subr.mxu0 %v133_v58  ;;  %v123_v46 = vld [vmem:[#allocation8 + $0x8] sm:$0xff] }
  0x6a   :  { %296 = vmatpush1.msra.mxu1 %v237_v48  ;;  %183 = vmatpush1.msra.mxu0 %v132_v60  ;;  %v125_v48 = vld [vmem:[#allocation8 + $0x18] sm:$0xff] }
  0x6b   :  { %297 = vmatprep.subr.mxu1 %v236_v50  ;;  %184 = vmatprep.subr.mxu0 %v131_v61 }
  0x6c   :  { %298 = vmatpush1.msra.mxu1 %v235_v52  ;;  %185 = vmatpush1.msra.mxu0 %v130_v62 }
  0x6d   :  { %332 = vmatmul.mubr.f32.vlgmr.msra.gmra.mxu1 %v1101_v54  ;;  %463 = vmatprep.subr.mxu1 %v1045_v15 }
  0x6e   :  { %337 = vmatprep.mubr.f32.mxu1 %v961_v0  ;;  %464 = vmatpush1.msra.mxu1 %v1047_v16 }
  0x6f   :  { %465 = vmatprep.subr.mxu1 %v1050_v18  ;;  %186 = vmatprep.subr.mxu0 %v129_v63 }
  0x70   :  { %466 = vmatpush1.msra.mxu1 %v1052_v19  ;;  %187 = vmatpush1.msra.mxu0 %v128_v1 }
  0x71   :  { %338 = vmatmul.mubr.f32.gmra.mxu1 %v1106_v59  ;;  %467 = vmatprep.subr.mxu1 %v1055_v21 }
  0x72   :  { %468 = vmatpush1.msra.mxu1 %v1058_v23  ;;  %188 = vmatprep.subr.mxu0 %v127_v2 }
  0x73   :  { %469 = vmatprep.subr.mxu1 %v1061_v25  ;;  %189 = vmatpush1.msra.mxu0 %v126_v3  ;;  %v717_v25 = vld [vmem:[%s1165_s5] ss:$0 sm:$0xff] }
  0x74   :  { %470 = vmatpush1.msra.mxu1 %v1064_v27  ;;  %223 = vmatmul.mubr.f32.vlgmr.msra.gmra.mxu0 %v1114_v4 }
  0x75   :  { %471 = vmatprep.subr.mxu1 %v1067_v29  ;;  %228 = vmatprep.mubr.f32.mxu0 %v961_v0 }
  0x76   :  { %472 = vmatpush1.msra.mxu1 %v1070_v31  ;;  %527 = vmatprep.mubr.f32.mxu1 %v961_v0 }
  0x77   :  { %473 = vmatprep.subr.mxu1 %v1073_v33 }
  0x78   :  { %474 = vmatpush1.msra.mxu1 %v1076_v35  ;;  %229 = vmatmul.mubr.f32.gmra.mxu0 %v1133_v5 }
  0x79   :  { %475 = vmatprep.subr.mxu1 %v1079_v37  ;;  %748 = vmatprep.mubr.msk.f32.mxu0 %vm351_vm0, %v120_v6 }
  0x7a   :  { %476 = vmatpush1.msra.mxu1 %v1082_v39 }
  0x7b   :  { %477 = vmatprep.subr.mxu1 %v1085_v41 }
  0x7c   :  { %478 = vmatpush1.msra.mxu1 %v1088_v43 }
  0x7d   :  { %479 = vmatprep.subr.mxu1 %v1091_v45 }
  0x7e   :  { %480 = vmatpush1.msra.mxu1 %v1094_v47  ;;  %v124_v47 = vld [vmem:[#allocation8 + $0x10] sm:$0xff] }
  0x7f   :  { %481 = vmatprep.subr.mxu1 %v1097_v49 }
  0x80   :  { %482 = vmatpush1.msra.mxu1 %v138_v51 }
  0x81   :  { %483 = vmatprep.subr.mxu1 %v137_v53 }
  0x82   :  { %484 = vmatpush1.msra.mxu1 %v136_v55 }
  0x83   :  { %485 = vmatprep.subr.mxu1 %v135_v56 }
  0x84   :  { %486 = vmatpush1.msra.mxu1 %v134_v57 }
  0x85   :  { %487 = vmatprep.subr.mxu1 %v133_v58 }
  0x86   :  { %488 = vmatpush1.msra.mxu1 %v132_v60 }
  0x87   :  { %489 = vmatprep.subr.mxu1 %v131_v61 }
  0x88   :  { %490 = vmatpush1.msra.mxu1 %v130_v62 }
  0x89   :  { %491 = vmatprep.subr.mxu1 %v129_v63 }
  0x8a   :  { %492 = vmatpush1.msra.mxu1 %v128_v1 }
  0x8b   :  { %493 = vmatprep.subr.mxu1 %v127_v2 }
  0x8c   :  { %494 = vmatpush1.msra.mxu1 %v126_v3  ;;  %v723_v3 = vld [vmem:[%s1167_s7] ss:$0 sm:$0xff]  ;;  %s962_s7 = smov [#allocation13]  }
  0x8d   :  { %s702_s22 = sshll.u32 %s962_s7, 4  ;;  %s703_s22 = int_to_ptr.vmem [resolvable:$true] %s702_s22 }
  0x8e   :  { %s921_s23 = scalar_lea.vmem %s703_s22, 512  ;;  %p926_p3 = scmp.lt.s32.totalorder %s703_s22, %s703_s22 }
  0x8f   :  { %p922_p2 = scmp.ne.s32.totalorder %s703_s22, %s921_s23  ;;  %p927_p4 = scmp.lt.s32.totalorder %s921_s23, %s921_s23 }
  0x91   :  { %p928_p5 = por %p927_p4, %p926_p3 }
  0x93   :  { %p929_p6 = pnand %p928_p5, %p922_p2 }
 0x12d   :  { %v333_v7 = vpop.f32.mrf.mxu1 }
 0x12f   :  { %v335_v8 = vpop.f32.mrf.mxu1 }
 0x130   :  { %v441_v15 = vadd.f32 %v720_v14, %v335_v8 }
 0x131   :  { %v339_v9 = vpop.f32.mrf.mxu1 }
 0x132   :  { %744 = vmatprep.subr.mxu0 %v339_v9  ;;  %v721_v17 = vmul.f32 -1.442695, %v441_v15 }
 0x133   :  { %745 = vmatpush3.msra.mxu0 %v339_v9  ;;  %v341_v16 = vpop.f32.mrf.mxu1 }
 0x134   :  { %746 = vmatprep.subr.mxu0 %v333_v7  ;;  %v224_v11 = vpop.f32.mrf.mxu0  ;;  %v442_v18 = vadd.f32 %v720_v14, %v341_v16  ;;  %777 = vpow2.f32 %v721_v17 }
 0x135   :  { %747 = vmatpush3.msra.mxu0 %v333_v7 }
 0x136   :  { %749 = vmatmul.mubr.msk.f32.vlgmr.msra.gmra.mxu0 %vm351_vm0, %v121_v10  ;;  %v226_v12 = vpop.f32.mrf.mxu0  ;;  %v722_v19 = vmul.f32 -1.442695, %v442_v18 }
 0x137   :  { %759 = vmatprep.mubr.msk.f32.mxu0 %vm547_vm1, %v122_v42  ;;  %v663_v53 = vadd.f32 %v720_v14, %v226_v12 }
 0x138   :  { %v230_v13 = vpop.f32.mrf.mxu0  ;;  %779 = vpow2.f32 %v722_v19 }
 0x139   :  { %751 = vmatprep.subr.mxu0 %v230_v13  ;;  %v730_v56 = vmul.f32 -1.442695, %v663_v53 }
 0x13a   :  { %752 = vmatpush3.msra.mxu0 %v230_v13  ;;  %v232_v24 = vpop.f32.mrf.mxu0 }
 0x13b   :  { %753 = vmatprep.subr.mxu0 %v224_v11  ;;  %v664_v51 = vadd.f32 %v720_v14, %v232_v24 }
 0x13c   :  { %754 = vmatpush3.msra.mxu0 %v224_v11 }
 0x13d   :  { %v731_v55 = vmul.f32 -1.442695, %v664_v51 }
 0x141   :  { %v778_v20 = vpop.eup %777 }
 0x142   :  { %v449_v21 = vadd.f32 1.0, %v778_v20 }
 0x144   :  { %781 = vrcp.f32 %v449_v21 }
 0x145   :  { %v780_v22 = vpop.eup %779 }
 0x146   :  { %v450_v23 = vadd.f32 1.0, %v780_v22 }
 0x148   :  { %783 = vrcp.f32 %v450_v23 }
 0x151   :  { %v782_v26 = vpop.eup %781 }
 0x152   :  { %v457_v31 = vsub.f32 1.0, %v782_v26 }
 0x154   :  { %v459_v36 = vmul.f32 %v457_v31, %v1101_v54 }
 0x155   :  { %v784_v32 = vpop.eup %783 }
 0x156   :  { %v458_v37 = vsub.f32 1.0, %v784_v32 }
 0x158   :  { %v460_v40 = vmul.f32 %v458_v37, %v1106_v59 }
 0x1f6   :  { %v750_v27 = vpop.f32.mrf.mxu0 }
 0x1f7   :  { %v430_v28 = vadd.f32 %v750_v27, %v717_v25 }
 0x1f8   :  { %v424_v29 = vpop.f32.mrf.mxu0 }
 0x1f9   :  { %v425_v30 = vadd.f32 %v717_v25, %v424_v29  ;;  %v434_v33 = vmax.f32 %v430_v28, 0.0 }
 0x1fb   :  { %v433_v34 = vmax.f32 %v425_v30, 0.0  ;;  %v456_v38 = vmul.f32 %v784_v32, %v434_v33 }
 0x1fd   :  { %v455_v35 = vmul.f32 %v782_v26, %v433_v34  ;;  %v462_v41 = vadd.f32 %v460_v40, %v456_v38 }
 0x1ff   :  { %v1143_v39 = vadd.f32 %v459_v36, %v455_v35 }
 0x201   :  { %528 = vmatmul.mubr.f32.vlgmr.msra.gmra.mxu1 %v1143_v39 }
 0x202   :  { %533 = vmatprep.mubr.f32.mxu1 %v961_v0 }
 0x205   :  { %534 = vmatmul.mubr.f32.gmra.mxu1 %v462_v41 }
 0x2c1   :  { %v529_v43 = vpop.f32.mrf.mxu1 }
 0x2c3   :  { %v531_v44 = vpop.f32.mrf.mxu1 }
 0x2c4   :  { %v649_v50 = vadd.f32 %v720_v14, %v531_v44 }
 0x2c5   :  { %v535_v45 = vpop.f32.mrf.mxu1 }
 0x2c6   :  { %755 = vmatprep.subr.mxu0 %v535_v45  ;;  %v728_v54 = vmul.f32 -1.442695, %v649_v50 }
 0x2c7   :  { %756 = vmatpush3.msra.mxu0 %v535_v45  ;;  %v537_v49 = vpop.f32.mrf.mxu1 }
 0x2c8   :  { %757 = vmatprep.subr.mxu0 %v529_v43  ;;  %v650_v0 = vadd.f32 %v720_v14, %v537_v49 }
 0x2c9   :  { %758 = vmatpush3.msra.mxu0 %v529_v43 }
 0x2ca   :  { %760 = vmatmul.mubr.msk.f32.vlgmr.msra.gmra.mxu0 %vm547_vm1, %v123_v46  ;;  %v729_v52 = vmul.f32 -1.442695, %v650_v0 }
 0x2cb   :  { %762 = vmatprep.mubr.msk.f32.mxu0 %vm547_vm1, %v124_v47 }
 0x2cc   :  { %785 = vpow2.f32 %v729_v52 }
 0x2cd   :  { %787 = vpow2.f32 %v728_v54 }
 0x2ce   :  { %763 = vmatmul.mubr.msk.f32.gmra.mxu0 %vm547_vm1, %v125_v48  ;;  %789 = vpow2.f32 %v731_v55 }
 0x2cf   :  { %791 = vpow2.f32 %v730_v56 }
 0x2d9   :  { %v786_v57 = vpop.eup %785 }
 0x2da   :  { %v788_v58 = vpop.eup %787  ;;  %v658_v60 = vadd.f32 1.0, %v786_v57 }
 0x2db   :  { %v790_v59 = vpop.eup %789  ;;  %v657_v61 = vadd.f32 1.0, %v788_v58 }
 0x2dc   :  { %v792_v62 = vpop.eup %791  ;;  %v672_v63 = vadd.f32 1.0, %v790_v59  ;;  %793 = vrcp.f32 %v658_v60 }
 0x2dd   :  { %v671_v1 = vadd.f32 1.0, %v792_v62  ;;  %795 = vrcp.f32 %v657_v61 }
 0x2de   :  { %797 = vrcp.f32 %v672_v63 }
 0x2df   :  { %799 = vrcp.f32 %v671_v1 }
 0x2e9   :  { %v794_v2 = vpop.eup %793 }
 0x2ea   :  { %v796_v6 = vpop.eup %795  ;;  %v680_v10 = vsub.f32 1.0, %v794_v2 }
 0x2eb   :  { %v798_v8 = vpop.eup %797  ;;  %v679_v12 = vsub.f32 1.0, %v796_v6 }
 0x2ec   :  { %v800_v13 = vpop.eup %799  ;;  %v690_v17 = vsub.f32 1.0, %v798_v8  ;;  %v682_v19 = vmul.f32 %v680_v10, %v462_v41 }
 0x2ed   :  { %v681_v22 = vmul.f32 %v679_v12, %v1143_v39  ;;  %v689_v24 = vsub.f32 1.0, %v800_v13 }
 0x2ee   :  { %v692_v31 = vmul.f32 %v690_v17, %v1133_v5 }
 0x2ef   :  { %v691_v35 = vmul.f32 %v689_v24, %v1114_v4 }
 0x38a   :  { %v761_v7 = vpop.f32.mrf.mxu0 }
 0x38b   :  { %v632_v9 = vadd.f32 %v761_v7, %v723_v3 }
 0x38c   :  { %v626_v11 = vpop.f32.mrf.mxu0 }
 0x38d   :  { %v646_v14 = vmax.f32 %v632_v9, 0.0  ;;  %v627_v15 = vadd.f32 %v723_v3, %v626_v11 }
 0x38e   :  { %v764_v16 = vpop.f32.mrf.mxu0 }
 0x38f   :  { %v678_v18 = vmul.f32 %v794_v2, %v646_v14  ;;  %v645_v20 = vmax.f32 %v627_v15, 0.0  ;;  %v642_v21 = vadd.f32 %v764_v16, %v723_v3 }
 0x390   :  { %v636_v23 = vpop.f32.mrf.mxu0 }
 0x391   :  { %v684_v25 = vadd.f32 %v682_v19, %v678_v18  ;;  %v677_v26 = vmul.f32 %v796_v6, %v645_v20  ;;  %v648_v27 = vmax.f32 %v642_v21, 0.0  ;;  %v637_v28 = vadd.f32 %v723_v3, %v636_v23 }
 0x393   :  { %686 = vst [vmem:[#allocation13 + $0x8] sm:$0xff] %v684_v25  ;;  %v683_v29 = vadd.f32 %v681_v22, %v677_v26  ;;  %v688_v30 = vmul.f32 %v798_v8, %v648_v27  ;;  %v647_v32 = vmax.f32 %v637_v28, 0.0 }
 0x395   :  { %685 = vst [vmem:[#allocation13] sm:$0xff] %v683_v29  ;;  %v694_v33 = vadd.f32 %v692_v31, %v688_v30  ;;  %v687_v34 = vmul.f32 %v800_v13, %v647_v32 }
 0x397   :  { %696 = vst [vmem:[#allocation13 + $0x18] sm:$0xff] %v694_v33  ;;  %v693_v36 = vadd.f32 %v691_v35, %v687_v34 }
 0x399   :  { %695 = vst [vmem:[#allocation13 + $0x10] sm:$0xff] %v693_v36 }
 0x39a   :  { %932 = shalt.err (!%p929_p6)
}
 0x39b   :  { %708 = dma.vmem_to_hbm [thread:$0]  %s703_s22, 512, %s1169_s9, [#allocation4], %s953_s14, %s953_s14, %s954_s15  }
 0x39c   :  { %949 = dma.done.wait [#allocation4], 512  }
 0x39d   :  { %950 = vsyncadd [#allocation4], 4294966784 }
 0x39e   :  { %712 = vsyncpa [#allocation3], 1 }
 0x39f   :  { %713 = vsyncpa [#allocation6], 1 }
 0x3a0   :  { %714 = vsyncpa [#allocation9], 1 }
 0x3a1   :  { %715 = vsyncpa [#allocation12], 1 }
 0x3a2   :  { %716 = vsyncpa [#allocation4], 1 }

</bundles_post_ra>
